<compile_context>
chip_gen: v6e
topology: v6e:2x2x1
jax: 0.10.0
libtpu: 0.0.40
codegen_flags: <defaults>
</compile_context>

<pallas_src>
import functools

import jax
import jax.numpy as jnp
from jax import lax
from jax.experimental import pallas as pl
from jax.experimental.pallas import tpu as pltpu

CONFIDENCE_WEIGHT = 0.2
UNCERTAINTY_THRESHOLD = 0.5  # TODO(synk): unused in the module's forward pass (kept for parity)
PAD_TOKEN_ID = 11


def _cdiv(a, b):
    return (a + b - 1) // b


def _round_up(x, m):
    return ((x + m - 1) // m) * m


def _pack4(a, b, c_, d):
    """Pack four (1, 1) f32 partial sums into one (1, 1, 4) block (single store)."""
    lane = lax.broadcasted_iota(jnp.int32, (1, 4), 1)
    packed = (a * (lane == 0) + b * (lane == 1) + c_ * (lane == 2) + d * (lane == 3))
    return packed.reshape(1, 1, 4)


def _ce_terms(logits_ref, targets_ref, colids_ref, *, n_total, ragged):
    """Per-row masked CE, pad mask and max softmax prob for one row tile."""
    tr = logits_ref.shape[0]
    logits = logits_ref[...].astype(jnp.float32)      # in-register cast, native HBM stream
    targets = targets_ref[...]                        # [TR, 1] int32
    col = colids_ref[...]                             # [1, C] int32 (revisited block)

    max_logit = jnp.max(logits, axis=-1, keepdims=True)
    shifted = logits - max_logit                      # [TR, C]

    if ragged:
        # Rows past N in the (only) partial last block contain garbage (possibly
        # inf/NaN): neutralize before exp and drop them from every sum.
        row = lax.broadcasted_iota(jnp.int32, (tr, 1), 0) + pl.program_id(0) * tr
        valid = row < n_total                         # [TR, 1] bool
        shifted = jnp.where(valid, shifted, 0.0)
        pad_mask = valid & (targets != PAD_TOKEN_ID)
    else:
        valid = None
        pad_mask = targets != PAD_TOKEN_ID

    sumexp = jnp.sum(jnp.exp(shifted), axis=-1, keepdims=True)     # [TR, 1]
    log_sumexp = jnp.log(sumexp)
    # Fused one-hot multiply-accumulate (compare + mul + reduce-add).
    tgt_shifted = jnp.sum(shifted * (col == targets).astype(jnp.float32),
                          axis=-1, keepdims=True)                  # [TR, 1]
    ce = log_sumexp - tgt_shifted                                  # [TR, 1]

    mask = pad_mask.astype(jnp.float32)                            # [TR, 1]
    base = ce * mask                                               # pad/ragged rows -> 0
    max_prob = 1.0 / sumexp                   # max(exp(shifted)) == 1 exactly
    return base, mask, max_prob, valid


def _kernel_model_conf(logits_ref, targets_ref, colids_ref, out_ref, *,
                       n_total, ragged):
    """confidence_scores is None: confidence = max softmax prob, conf_reg == 0."""
    base, mask, max_prob, _ = _ce_terms(logits_ref, targets_ref, colids_ref,
                                        n_total=n_total, ragged=ragged)
    weights = 1.0 + CONFIDENCE_WEIGHT * (1.0 - max_prob)
    weighted = base * weights                 # base is already pad/ragged-masked
    out_ref[...] = _pack4(jnp.sum(base, keepdims=True),
                          jnp.sum(mask, keepdims=True),
                          jnp.sum(weighted, keepdims=True),
                          jnp.zeros((1, 1), jnp.float32))


def _kernel_given_conf(logits_ref, targets_ref, colids_ref, conf_ref, out_ref, *,
                       n_total, ragged):
    """confidence_scores provided externally."""
    base, mask, max_prob, valid = _ce_terms(logits_ref, targets_ref, colids_ref,
                                            n_total=n_total, ragged=ragged)
    conf = conf_ref[...].astype(jnp.float32)
    if ragged:
        conf = jnp.where(valid, conf, 0.0)    # NaN-safe: drop garbage tail rows
    weights = 1.0 + CONFIDENCE_WEIGHT * (1.0 - conf)
    weighted = base * weights
    creg = jnp.abs(conf - max_prob)
    if ragged:
        creg = jnp.where(valid, creg, 0.0)    # tail rows must not hit the regularizer
    out_ref[...] = _pack4(jnp.sum(base, keepdims=True),
                          jnp.sum(mask, keepdims=True),
                          jnp.sum(weighted, keepdims=True),
                          jnp.sum(creg, keepdims=True))


def _default_vmem_limit_bytes():
    # Headroom below the *physical* VMEM of this generation
    # (v5e/v6e: 128 MiB, v7x: 64 MiB); never rely on the 16/32 MiB default.
    try:
        cap = int(pltpu.get_tpu_info().vmem_capacity_bytes)
    except Exception:
        cap = 64 * 1024 * 1024  # assume the smallest generation (v7x)
    return min(cap * 3 // 4, 96 * 1024 * 1024)


def _pick_tile_rows(n_rows, num_classes, itemsize, vmem_limit_bytes, row_align,
                    target_block_bytes=4 << 20):
    # Bytes-targeted tile: ~4 MiB logits blocks amortize the ~0.35us per-grid-step
    # overhead on every generation (no flat row cap).
    tile = max(row_align, target_block_bytes // (num_classes * itemsize))
    # VMEM cap: 2x double-buffered native-dtype input tile + ~5 live f32 [TR, C]
    # temporaries that Mosaic may materialize (tight on v7x's 64 MiB).
    budget = int(vmem_limit_bytes * 0.6)
    per_row = 2 * num_classes * itemsize + 5 * 4 * num_classes + 64
    tile = min(tile, max(row_align, budget // per_row))
    # Never exceed the (row-aligned) problem size.
    tile = min(tile, _round_up(n_rows, row_align))
    # Keep >= 2 tiles so the "parallel" grid axis can shard across both
    # TensorCores on v7x (no-op on 1-TC v5e/v6e).
    if n_rows > row_align:
        tile = min(tile, _round_up(_cdiv(n_rows, 2), row_align))
    return max(row_align, (tile // row_align) * row_align)


def confidence_aware_loss(predictions, targets, confidence_scores=None, *,
                          tile_rows=None, vmem_limit_bytes=None):
    """predictions [B,S,C] (any float dtype), targets [B,S] int, confidence [B,S] or None."""
    b, s, c = predictions.shape
    n = b * s

    # No dtype cast here: bf16/f32 streams at native width (cast happens in-register).
    logits = predictions.reshape(n, c)
    tgt = targets.reshape(n, 1).astype(jnp.int32)
    col_ids = jnp.arange(c, dtype=jnp.int32).reshape(1, c)

    itemsize = logits.dtype.itemsize
    row_align = max(8, 32 // itemsize)          # 8 f32 / 16 bf16 / 32 int8
    if vmem_limit_bytes is None:
        vmem_limit_bytes = _default_vmem_limit_bytes()
    if tile_rows is None:
        tile_rows = _pick_tile_rows(n, c, itemsize, vmem_limit_bytes, row_align)
    tile_rows = int(min(_round_up(max(int(tile_rows), 1), row_align),
                        _round_up(n, row_align)))

    num_tiles = _cdiv(n, tile_rows)
    ragged = (n % tile_rows) != 0               # last block has garbage tail rows

    logits_spec = pl.BlockSpec((tile_rows, c), lambda i: (i, 0))
    col_spec = pl.BlockSpec((tile_rows, 1), lambda i: (i, 0))
    ids_spec = pl.BlockSpec((1, c), lambda i: (0, 0))       # revisited -> DMA'd once
    part_shape = jax.ShapeDtypeStruct((num_tiles, 1, 4), jnp.float32)
    part_spec = pl.BlockSpec((1, 1, 4), lambda i: (i, 0, 0))
    compiler_params = pltpu.CompilerParams(
        dimension_semantics=("parallel",),       # tiles are fully independent
        vmem_limit_bytes=int(vmem_limit_bytes))
    in_bytes = n * c * itemsize + n * 4 + c * 4
    if confidence_scores is not None:
        in_bytes += n * confidence_scores.dtype.itemsize
    cost = pl.CostEstimate(flops=int(8 * n * c),
                           transcendentals=int(n * c + n),
                           bytes_accessed=int(in_bytes + num_tiles * 16))

    if confidence_scores is None:
        parts = pl.pallas_call(
            functools.partial(_kernel_model_conf, n_total=n, ragged=ragged),
            out_shape=part_shape,
            grid_spec=pltpu.PrefetchScalarGridSpec(
                num_scalar_prefetch=0,
                grid=(num_tiles,),
                in_specs=[logits_spec, col_spec, ids_spec],
                out_specs=part_spec),
            compiler_params=compiler_params,
            cost_estimate=cost,
        )(logits, tgt, col_ids)
        conf_reg = jnp.zeros((), jnp.float32)    # conf == max_prob exactly
    else:
        conf = confidence_scores.reshape(n, 1)
        parts = pl.pallas_call(
            functools.partial(_kernel_given_conf, n_total=n, ragged=ragged),
            out_shape=part_shape,
            grid_spec=pltpu.PrefetchScalarGridSpec(
                num_scalar_prefetch=0,
                grid=(num_tiles,),
                in_specs=[logits_spec, col_spec, ids_spec, col_spec],
                out_specs=part_spec),
            compiler_params=compiler_params,
            cost_estimate=cost,
        )(logits, tgt, col_ids, conf)
        conf_reg = jnp.sum(parts[:, :, 3]) / n

    base_loss = jnp.sum(parts[:, :, 0]) / n                  # mean over ALL B*S positions
    denom = jnp.maximum(jnp.sum(parts[:, :, 1]), 1.0)        # mask.sum().clamp(min=1)
    total_loss = jnp.sum(parts[:, :, 2]) / denom + CONFIDENCE_WEIGHT * conf_reg
    return {"base_loss": base_loss,
            "confidence_loss": conf_reg,
            "total_loss": total_loss}


def _reference(predictions, targets, confidence_scores=None):
    """Pure-JAX reference mirroring the PyTorch forward."""
    logits = predictions.astype(jnp.float32)
    logp = jax.nn.log_softmax(logits, axis=-1)
    ce = -jnp.take_along_axis(logp, targets[..., None], axis=-1)[..., 0]
    mask = (targets != PAD_TOKEN_ID).astype(jnp.float32)
    base_losses = ce * mask
    probs = jax.nn.softmax(logits, axis=-1)
    max_prob = jnp.max(probs, axis=-1)
    conf = max_prob if confidence_scores is None else confidence_scores.astype(jnp.float32)
    weights = 1.0 + CONFIDENCE_WEIGHT * (1.0 - conf)
    total_main = jnp.sum(base_losses * weights * mask) / jnp.maximum(jnp.sum(mask), 1.0)
    conf_reg = jnp.mean(jnp.abs(conf - max_prob))
    return {"base_loss": jnp.mean(base_losses),
            "confidence_loss": conf_reg,
            "total_loss": total_main + CONFIDENCE_WEIGHT * conf_reg}


if __name__ == "__main__":
    key = jax.random.PRNGKey(0)
    k1, k2, k3 = jax.random.split(key, 3)

    B, S, C = 2, 8, 32
    predictions = jax.random.normal(k1, (B, S, C), dtype=jnp.float32)
    targets = jax.random.randint(k2, (B, S), 0, C, dtype=jnp.int32)
    targets = targets.at[0, :2].set(PAD_TOKEN_ID)     # exercise ignore_index path
    confidence_scores = jax.random.uniform(k3, (B, S), dtype=jnp.float32)

    # 1) external confidence, auto tile policy (2 tiles of 8 rows at this size)
    out1 = confidence_aware_loss(predictions, targets, confidence_scores)
    # 2) model confidence (specialized kernel), multi-tile grid, N % tile == 0
    out2 = confidence_aware_loss(predictions, targets, None, tile_rows=8)

    # 3/4) ragged N (26 rows, tile 16 -> 2 tiles, partial last block) + bf16
    #      native streaming, no wrapper cast and no jnp.pad copy.
    S2 = 13
    preds_bf16 = jax.random.normal(k1, (B, S2, C), dtype=jnp.float32).astype(jnp.bfloat16)
    targets2 = jax.random.randint(k2, (B, S2), 0, C, dtype=jnp.int32)
    targets2 = targets2.at[1, :3].set(PAD_TOKEN_ID)
    conf2 = jax.random.uniform(k3, (B, S2), dtype=jnp.float32)
    out3 = confidence_aware_loss(preds_bf16, targets2, conf2, tile_rows=16)
    out4 = confidence_aware_loss(preds_bf16, targets2, None, tile_rows=16)

    jax.block_until_ready((out1, out2, out3, out4))

    checks = [
        (out1, _reference(predictions, targets, confidence_scores)),
        (out2, _reference(predictions, targets, None)),
        (out3, _reference(preds_bf16, targets2, conf2)),
        (out4, _reference(preds_bf16, targets2, None)),
    ]
    for o, r in checks:
        for name in ("base_loss", "confidence_loss", "total_loss"):
            assert jnp.allclose(o[name], r[name], atol=1e-5, rtol=1e-4), \
                (name, o[name], r[name])

    print("KERNEL_OK")
</pallas_src>

<mosaic_0001>
module attributes {stable_mosaic.version = 11 : i64} {
  func.func @_kernel_given_conf(%arg0: i32, %arg1: memref<8x32xf32, #tpu.memory_space<vmem>>, %arg2: memref<8x1xi32, #tpu.memory_space<vmem>>, %arg3: memref<1x32xi32, #tpu.memory_space<vmem>>, %arg4: memref<8x1xf32, #tpu.memory_space<vmem>>, %arg5: memref<1x1x4xf32, #tpu.memory_space<vmem>>) attributes {dimension_semantics = [#tpu.dimension_semantics<parallel>], iteration_bounds = array<i64: 2>, scalar_prefetch = 0 : i64, scratch_operands = 0 : i64, tpu.core_type = #tpu.core_type<tc>, window_params = [{transform_indices = @transform_0, window_bounds = array<i64: 8, 32>}, {transform_indices = @transform_1, window_bounds = array<i64: 8, 1>}, {pipeline_mode = #tpu.pipeline_mode<synchronous>, transform_indices = @transform_2, window_bounds = array<i64: 1, 32>}, {transform_indices = @transform_3, window_bounds = array<i64: 8, 1>}, {transform_indices = @transform_4, window_bounds = array<i64: 1, 1, 4>}]} {
    %c0 = arith.constant 0 : index
    %c0_0 = arith.constant 0 : index
    %0 = vector.load %arg1[%c0, %c0_0] : memref<8x32xf32, #tpu.memory_space<vmem>>, vector<8x32xf32>
    %c0_1 = arith.constant 0 : index
    %c0_2 = arith.constant 0 : index
    %1 = vector.load %arg2[%c0_1, %c0_2] : memref<8x1xi32, #tpu.memory_space<vmem>>, vector<8x1xi32>
    %c0_3 = arith.constant 0 : index
    %c0_4 = arith.constant 0 : index
    %2 = vector.load %arg3[%c0_3, %c0_4] : memref<1x32xi32, #tpu.memory_space<vmem>>, vector<1x32xi32>
    %cst = arith.constant dense<0xFF800000> : vector<8xf32>
    %3 = vector.multi_reduction <maximumf>, %0, %cst [1] : vector<8x32xf32> to vector<8xf32>
    %4 = vector.shape_cast %3 : vector<8xf32> to vector<8x1xf32>
    %5 = vector.broadcast %4 : vector<8x1xf32> to vector<8x32xf32>
    %6 = arith.subf %0, %5 : vector<8x32xf32>
    %c11_i32 = arith.constant 11 : i32
    %7 = vector.broadcast %c11_i32 : i32 to vector<8x1xi32>
    %8 = arith.cmpi ne, %1, %7 : vector<8x1xi32>
    %9 = math.exp %6 : vector<8x32xf32>
    %cst_5 = arith.constant dense<0.000000e+00> : vector<8xf32>
    %10 = vector.multi_reduction <add>, %9, %cst_5 [1] : vector<8x32xf32> to vector<8xf32>
    %11 = vector.shape_cast %10 : vector<8xf32> to vector<8x1xf32>
    %12 = math.log %11 : vector<8x1xf32>
    %13 = vector.broadcast %2 : vector<1x32xi32> to vector<8x32xi32>
    %14 = vector.broadcast %1 : vector<8x1xi32> to vector<8x32xi32>
    %15 = arith.cmpi eq, %13, %14 : vector<8x32xi32>
    %16 = arith.extui %15 : vector<8x32xi1> to vector<8x32xi32>
    %17 = arith.sitofp %16 : vector<8x32xi32> to vector<8x32xf32>
    %18 = arith.mulf %6, %17 : vector<8x32xf32>
    %cst_6 = arith.constant dense<0.000000e+00> : vector<8xf32>
    %19 = vector.multi_reduction <add>, %18, %cst_6 [1] : vector<8x32xf32> to vector<8xf32>
    %20 = vector.shape_cast %19 : vector<8xf32> to vector<8x1xf32>
    %21 = arith.subf %12, %20 : vector<8x1xf32>
    %22 = arith.extui %8 : vector<8x1xi1> to vector<8x1xi32>
    %23 = arith.sitofp %22 : vector<8x1xi32> to vector<8x1xf32>
    %24 = arith.mulf %21, %23 : vector<8x1xf32>
    %cst_7 = arith.constant 1.000000e+00 : f32
    %25 = vector.broadcast %cst_7 : f32 to vector<8x1xf32>
    %26 = arith.divf %25, %11 : vector<8x1xf32>
    %c0_8 = arith.constant 0 : index
    %c0_9 = arith.constant 0 : index
    %27 = vector.load %arg4[%c0_8, %c0_9] : memref<8x1xf32, #tpu.memory_space<vmem>>, vector<8x1xf32>
    %cst_10 = arith.constant 1.000000e+00 : f32
    %28 = vector.broadcast %cst_10 : f32 to vector<8x1xf32>
    %29 = arith.subf %28, %27 : vector<8x1xf32>
    %cst_11 = arith.constant 2.000000e-01 : f32
    %30 = vector.broadcast %cst_11 : f32 to vector<8x1xf32>
    %31 = arith.mulf %30, %29 : vector<8x1xf32>
    %cst_12 = arith.constant 1.000000e+00 : f32
    %32 = vector.broadcast %cst_12 : f32 to vector<8x1xf32>
    %33 = arith.addf %32, %31 : vector<8x1xf32>
    %34 = arith.mulf %24, %33 : vector<8x1xf32>
    %35 = arith.subf %27, %26 : vector<8x1xf32>
    %36 = math.absf %35 : vector<8x1xf32>
    %37 = vector.shape_cast %24 : vector<8x1xf32> to vector<1x8x1xf32>
    %cst_13 = arith.constant dense<0.000000e+00> : vector<1xf32>
    %38 = vector.multi_reduction <add>, %37, %cst_13 [1, 2] : vector<1x8x1xf32> to vector<1xf32>
    %39 = vector.shape_cast %38 : vector<1xf32> to vector<1x1x1xf32>
    %40 = vector.extract %39[0, 0, 0] : f32 from vector<1x1x1xf32>
    %41 = vector.broadcast %40 : f32 to vector<1x1xf32>
    %42 = vector.shape_cast %23 : vector<8x1xf32> to vector<1x8x1xf32>
    %cst_14 = arith.constant dense<0.000000e+00> : vector<1xf32>
    %43 = vector.multi_reduction <add>, %42, %cst_14 [1, 2] : vector<1x8x1xf32> to vector<1xf32>
    %44 = vector.shape_cast %43 : vector<1xf32> to vector<1x1x1xf32>
    %45 = vector.extract %44[0, 0, 0] : f32 from vector<1x1x1xf32>
    %46 = vector.broadcast %45 : f32 to vector<1x1xf32>
    %47 = vector.shape_cast %34 : vector<8x1xf32> to vector<1x8x1xf32>
    %cst_15 = arith.constant dense<0.000000e+00> : vector<1xf32>
    %48 = vector.multi_reduction <add>, %47, %cst_15 [1, 2] : vector<1x8x1xf32> to vector<1xf32>
    %49 = vector.shape_cast %48 : vector<1xf32> to vector<1x1x1xf32>
    %50 = vector.extract %49[0, 0, 0] : f32 from vector<1x1x1xf32>
    %51 = vector.broadcast %50 : f32 to vector<1x1xf32>
    %52 = vector.shape_cast %36 : vector<8x1xf32> to vector<1x8x1xf32>
    %cst_16 = arith.constant dense<0.000000e+00> : vector<1xf32>
    %53 = vector.multi_reduction <add>, %52, %cst_16 [1, 2] : vector<1x8x1xf32> to vector<1xf32>
    %54 = vector.shape_cast %53 : vector<1xf32> to vector<1x1x1xf32>
    %55 = vector.extract %54[0, 0, 0] : f32 from vector<1x1x1xf32>
    %56 = vector.broadcast %55 : f32 to vector<1x1xf32>
    %57 = tpu.iota {dimensions = array<i32: 1>} : vector<1x4xi32>
    %c0_i32 = arith.constant 0 : i32
    %58 = vector.broadcast %c0_i32 : i32 to vector<1x4xi32>
    %59 = arith.cmpi eq, %57, %58 : vector<1x4xi32>
    %60 = arith.extui %59 : vector<1x4xi1> to vector<1x4xi32>
    %61 = arith.sitofp %60 : vector<1x4xi32> to vector<1x4xf32>
    %62 = vector.broadcast %41 : vector<1x1xf32> to vector<1x4xf32>
    %63 = arith.mulf %62, %61 : vector<1x4xf32>
    %c1_i32 = arith.constant 1 : i32
    %64 = vector.broadcast %c1_i32 : i32 to vector<1x4xi32>
    %65 = arith.cmpi eq, %57, %64 : vector<1x4xi32>
    %66 = arith.extui %65 : vector<1x4xi1> to vector<1x4xi32>
    %67 = arith.sitofp %66 : vector<1x4xi32> to vector<1x4xf32>
    %68 = vector.broadcast %46 : vector<1x1xf32> to vector<1x4xf32>
    %69 = arith.mulf %68, %67 : vector<1x4xf32>
    %70 = arith.addf %63, %69 : vector<1x4xf32>
    %c2_i32 = arith.constant 2 : i32
    %71 = vector.broadcast %c2_i32 : i32 to vector<1x4xi32>
    %72 = arith.cmpi eq, %57, %71 : vector<1x4xi32>
    %73 = arith.extui %72 : vector<1x4xi1> to vector<1x4xi32>
    %74 = arith.sitofp %73 : vector<1x4xi32> to vector<1x4xf32>
    %75 = vector.broadcast %51 : vector<1x1xf32> to vector<1x4xf32>
    %76 = arith.mulf %75, %74 : vector<1x4xf32>
    %77 = arith.addf %70, %76 : vector<1x4xf32>
    %c3_i32 = arith.constant 3 : i32
    %78 = vector.broadcast %c3_i32 : i32 to vector<1x4xi32>
    %79 = arith.cmpi eq, %57, %78 : vector<1x4xi32>
    %80 = arith.extui %79 : vector<1x4xi1> to vector<1x4xi32>
    %81 = arith.sitofp %80 : vector<1x4xi32> to vector<1x4xf32>
    %82 = vector.broadcast %56 : vector<1x1xf32> to vector<1x4xf32>
    %83 = arith.mulf %82, %81 : vector<1x4xf32>
    %84 = arith.addf %77, %83 : vector<1x4xf32>
    %85 = vector.shape_cast %84 : vector<1x4xf32> to vector<1x1x4xf32>
    %c0_17 = arith.constant 0 : index
    %c0_18 = arith.constant 0 : index
    %c0_19 = arith.constant 0 : index
    %86 = vector.load %arg5[%c0_17, %c0_18, %c0_19] : memref<1x1x4xf32, #tpu.memory_space<vmem>>, vector<1x1x4xf32>
    tpu.vector_store %arg5[%c0_17, %c0_18, %c0_19], %85 {strides = array<i32>} : memref<1x1x4xf32, #tpu.memory_space<vmem>>, vector<1x1x4xf32>,
    return
  }
  func.func @transform_0(%arg0: i32) -> (i32, i32) {
    %c0_i32 = arith.constant 0 : i32
    %c0_i32_0 = arith.constant 0 : i32
    return %arg0, %c0_i32 : i32, i32
  }
  func.func @transform_1(%arg0: i32) -> (i32, i32) {
    %c0_i32 = arith.constant 0 : i32
    %c0_i32_0 = arith.constant 0 : i32
    return %arg0, %c0_i32 : i32, i32
  }
  func.func @transform_2(%arg0: i32) -> (i32, i32) {
    %c0_i32 = arith.constant 0 : i32
    %c0_i32_0 = arith.constant 0 : i32
    %c0_i32_1 = arith.constant 0 : i32
    return %c0_i32, %c0_i32_0 : i32, i32
  }
  func.func @transform_3(%arg0: i32) -> (i32, i32) {
    %c0_i32 = arith.constant 0 : i32
    %c0_i32_0 = arith.constant 0 : i32
    return %arg0, %c0_i32 : i32, i32
  }
  func.func @transform_4(%arg0: i32) -> (i32, i32, i32) {
    %c0_i32 = arith.constant 0 : i32
    %c0_i32_0 = arith.constant 0 : i32
    %c0_i32_1 = arith.constant 0 : i32
    return %arg0, %c0_i32, %c0_i32_0 : i32, i32, i32
  }
}

</mosaic_0001>

<bundles_post_ra>
// kernel: tpu_custom_call.1
= control target key start
LH: loop header
LB: loop body
LE: loop exit
PB: predicated region body
PF: predicated region fallthrough
CT: control target
= control target key end

     0   :  { %9 = vsyncpa [#allocation3], 0  ;;  %s706_s0 = inlined_call_operand.vmem [shape: f32[16,32], index: 0, kind: input, shape index: {}]   ;;  %s707_s1 = inlined_call_operand.vmem [shape: s32[16,1], index: 1, kind: input, shape index: {}]   ;;  %s708_s2 = inlined_call_operand.vmem [shape: s32[1,32], index: 2, kind: input, shape index: {}]   ;;  %s709_s3 = inlined_call_operand.vmem [shape: f32[16,1], index: 3, kind: input, shape index: {}]   ;;  %s710_s4 = inlined_call_operand.hbm [shape: f32[2,1,4], index: 4, kind: output, shape index: {}]  }
   0x1   :  { %11 = vsyncpa [#allocation3 + $0x1], 0  ;;  %s592_s15 = smov 0   ;;  %s594_s16 = smov 0  }
   0x2   :  { %s596_s17 = smov 0   ;;  %s598_s18 = smov 0  }
   0x3 LB: > { %s613_s19 = sadd.s32 4294967295, %s562_s18   ;;  %s429_s20 = sadd.s32 4294967294, %s562_s18   ;;  %s562_s18 = sphi %s598_s18, %s716_s18   ;;  %s558_s17 = sphi %s596_s17, %s715_s17   ;;  %s554_s16 = sphi %s594_s16, %s714_s16   ;;  %s550_s15 = sphi %s592_s15, %s713_s15  }
   0x4   : > { %s617_s21 = sadd.s32 1, %s562_s18   ;;  %s123_s22 = sadd.s32 1, %s558_s17 }
   0x5   : > { %s120_s23 = ssub.s32 %s562_s18, %s617_s21  ;;  %p133_p0 = scmp.ne.s32.totalorder %s558_s17, %s554_s16 }
   0x6   : > { %p121_p1 = scmp.eq.s32.totalorder %s120_s23, 0  ;;  %p134_p2 = scmp.eq.s32.totalorder %s613_s19, 1 }
   0x7   : > { %p139_p3 = scmp.ne.s32.totalorder %s554_s16, %s550_s15  ;;  %p140_p4 = scmp.eq.s32.totalorder %s429_s20, 1 }
   0x8   : > { %s628_s24 = scalar_select %p121_p1, %s558_s17, %s123_s22  }
   0x9   : > { %p630_p5 = por %p134_p2, %p133_p0  ;;  %p634_p6 = por %p140_p4, %p139_p3 }
   0xa   : > { %p432_p7 = scmp.ge.s32.totalorder %s562_s18, 1  ;;  %p182_p8 = scmp.lt.s32.totalorder %s562_s18, 3 }
   0xc   : > { %p183_p9 = pnand %p432_p7, %p182_p8 }
   0xd   : > { %p214_p10 = scmp.lt.s32.totalorder (!%p183_p9), %s613_s19, 1  ;;  %s212_s22 = sand.u32 (!%p183_p9), 1, %s554_s16  }
   0xe   : > { %186 = sbr.rel (%p183_p9) target bundleno = 567 (0x237), region = 36  ;;  %s213_s29 = scalar_lea.vmem (!%p183_p9), [#allocation2], %s212_s22 }
   0xf   : > { %s350_s30 = sshll.u32 (!%p183_p9), %s213_s29, 4  ;;  %s566_s10 = smov (!%p183_p9), [#allocation2]   ;;  %s351_s30 = int_to_ptr.vmem [resolvable:$true] %s350_s30 }
  0x10   : > { %s502_s9 = scalar_lea.vmem (!%p183_p9), %s351_s30, 16 }
  0x11   : > { %p503_p11 = scmp.ne.s32.totalorder (!%p183_p9), %s351_s30, %s502_s9 }
  0x13   : > { %v564_v0 = vmov 0   ;;  %s215_s27 = scalar_select %p214_p10, %s613_s19, 1  ;;  %vm229_vm0 = vcmask 261120   ;;  %v436_v7 = vld [vmem:[%s708_s2] ss:$0 sm:$0xff]  ;;  %v565_v9 = vmov 0.0   ;;  %v310_v62 = vlaneseq }
  0x14   : > { %495 = vset.pattern.permute.xlu0 %v564_v0  ;;  %vm269_vm3 = vcmask 7168   ;;  %vm335_vm8 = vcmask 24576   ;;  %p504_p12 = pnand %p503_p11, %p630_p5 }
  0x15   : > { %s642_s28 = sshll.u32 %s215_s27, 3  ;;  %v311_v63 = vand.u32 127, %v310_v62 }
  0x16   : > { %s217_s5 = scalar_lea.vmem %s706_s0, %s642_s28  ;;  %s221_s8 = scalar_lea.vmem %s707_s1, %s642_s28 }
  0x17   : > { %v226_v1 = vld [vmem:[%s217_s5] sm:$0xff]  ;;  %s225_s13 = scalar_lea.vmem %s709_s3, %s642_s28  ;;  %vm312_vm4 = vcmp.eq.s32.totalorder %v311_v63, 0  ;;  %vm317_vm5 = vcmp.eq.s32.totalorder %v311_v63, 1  ;;  %vm323_vm6 = vcmp.eq.s32.totalorder %v311_v63, 2  ;;  %vm329_vm7 = vcmp.eq.s32.totalorder %v311_v63, 3  ;;  %s443_s28 = sshll.u32 %s613_s19, 4 }
  0x18   : > { %v230_v2 = vsel %vm229_vm0, %v226_v1, -inf  ;;  %v227_v3 = vld [vmem:[%s221_s8] sm:$0xff]  ;;  %v439_v0 = vsel %vm312_vm4, 1.0, %v565_v9  ;;  %s348_s7 = scalar_lea.hbm %s710_s4, %s443_s28  ;;  %s338_s8 = scalar_lea.sflag [#allocation3], %s212_s22 }
  0x19   : > { %231 = vmax.xlane.f32.xlu0 %v230_v2  ;;  %vm234_vm2 = vcmp.ne.s32.totalorder %v227_v3, 11  ;;  %v262_v18 = vld [vmem:[%s225_s13] sm:$0xff]  ;;  %v440_v2 = vsel %vm317_vm5, 1.0, %v565_v9  ;;  %p505_p13 = pneg %p504_p12  ;;  %s506_s19 = sshll.u32 %s566_s10, 4  ;;  %s507_s19 = int_to_ptr.vmem [resolvable:$false] %s506_s19 }
  0x1a   : > { %v438_v15 = vsel %vm234_vm2, 1.0, %v565_v9  ;;  %v263_v19 = vsub.f32 1.0, %v262_v18  ;;  %s508_s11 = scalar_lea.vmem %s507_s19, 32  ;;  %p509_p0 = scmp.lt.s32.totalorder %s351_s30, %s507_s19 }
  0x1b   : > { %v280_v16 = vsel %vm269_vm3, %v438_v15, 0.0  ;;  %p510_p1 = scmp.lt.s32.totalorder %s508_s11, %s502_s9 }
  0x1c   : > { %v264_v20 = vmul.f32 0.2, %v263_v19 }
  0x1d   : > { %p511_p2 = por %p510_p1, %p509_p0 }
  0x1e   : > { %v265_v25 = vadd.f32 1.0, %v264_v20 }
  0x1f   : > { %p512_p3 = pnand %p511_p2, %p505_p13 }
  0x2f   : > { %247 = vperm.xlu0 %495, %v227_v3  }
  0xa2   : > { %v232_v4 = vpop.xlane.xlu0 %231 }
  0xa3   : > { %v233_v5 = vsub.f32 %v226_v1, %v232_v4  ;;  %v441_v4 = vsel %vm323_vm6, 1.0, %v565_v9 }
  0xa5   : > { %v235_v6 = vmul.f32 1.442695, %v233_v5 }
  0xa7   : > { %496 = vpow2.f32 %v235_v6 }
  0xaa   : > { %v248_v8 = vpop.permute.xlu0 %247 }
  0xab   : > { %vm249_vm1 = vcmp.eq.s32.totalorder %v436_v7, %v248_v8 }
  0xac   : > { %v437_v10 = vsel %vm249_vm1, 1.0, %v565_v9 }
  0xad   : > { %v252_v13 = vmul.f32 %v437_v10, %v233_v5  ;;  %v442_v10 = vsel %vm329_vm7, 1.0, %v565_v9 }
  0xaf   : > { %v253_v14 = vsel %vm229_vm0, %v252_v13, 0.0 }
  0xb4   : > { %v497_v11 = vpop.eup %496 }
  0xb5   : > { %v237_v12 = vsel %vm229_vm0, %v497_v11, 0.0 }
  0xb6   : > { %238 = vadd.xlane.f32.xlu1 %v237_v12 }
  0xba   : > { %254 = vadd.xlane.f32.xlu1 %v253_v14 }
  0xbe   : > { %281 = vadd.xlane.f32.xlu1 %v280_v16 }
 0x13f   : > { %v239_v17 = vpop.xlane.xlu1 %238 }
 0x140   : > { %498 = vlog2.f32 %v239_v17 }
 0x141   : > { %500 = vrcp.f32 %v239_v17 }
 0x143   : > { %v255_v23 = vpop.xlane.xlu1 %254 }
 0x147   : > { %v282_v34 = vpop.xlane.xlu1 %281 }
 0x148   : > { %v283_v35 = vrot.slane %v282_v34, 4 }
 0x14a   : > { %v284_v36 = vadd.f32 %v283_v35, %v282_v34 }
 0x14c   : > { %v285_v37 = vrot.slane %v284_v36, 2 }
 0x14d   : > { %v499_v21 = vpop.eup %498 }
 0x14e   : > { %v241_v22 = vmul.f32 0.6931472, %v499_v21  ;;  %v501_v26 = vpop.eup %500  ;;  %v286_v42 = vadd.f32 %v285_v37, %v284_v36 }
 0x14f   : > { %v267_v30 = vsub.f32 %v262_v18, %v501_v26 }
 0x150   : > { %v256_v24 = vsub.f32 %v241_v22, %v255_v23  ;;  %v287_v48 = vrot.slane %v286_v42, 1 }
 0x151   : > { %v268_v32 = vand.u32 2147483647, %v267_v30 }
 0x152   : > { %v259_v27 = vmul.f32 %v438_v15, %v256_v24  ;;  %v288_v55 = vadd.f32 %v287_v48, %v286_v42 }
 0x153   : > { %v300_v33 = vsel %vm269_vm3, %v268_v32, 0.0 }
 0x154   : > { %v270_v28 = vsel %vm269_vm3, %v259_v27, 0.0  ;;  %v266_v29 = vmul.f32 %v265_v25, %v259_v27 }
 0x155   : > { %271 = vadd.xlane.f32.xlu1 %v270_v28 }
 0x156   : > { %v290_v31 = vsel %vm269_vm3, %v266_v29, 0.0 }
 0x159   : > { %291 = vadd.xlane.f32.xlu1 %v290_v31 }
 0x15d   : > { %301 = vadd.xlane.f32.xlu1 %v300_v33 }
 0x1de   : > { %v272_v38 = vpop.xlane.xlu1 %271 }
 0x1df   : > { %v273_v39 = vrot.slane %v272_v38, 4 }
 0x1e1   : > { %v274_v40 = vadd.f32 %v273_v39, %v272_v38 }
 0x1e2   : > { %v292_v41 = vpop.xlane.xlu1 %291 }
 0x1e3   : > { %v275_v43 = vrot.slane %v274_v40, 2  ;;  %v293_v44 = vrot.slane %v292_v41, 4 }
 0x1e5   : > { %v294_v45 = vadd.f32 %v293_v44, %v292_v41  ;;  %v276_v46 = vadd.f32 %v275_v43, %v274_v40 }
 0x1e6   : > { %v302_v47 = vpop.xlane.xlu1 %301 }
 0x1e7   : > { %v295_v49 = vrot.slane %v294_v45, 2  ;;  %v303_v50 = vrot.slane %v302_v47, 4  ;;  %v277_v51 = vrot.slane %v276_v46, 1 }
 0x1e9   : > { %v304_v52 = vadd.f32 %v303_v50, %v302_v47  ;;  %v278_v53 = vadd.f32 %v277_v51, %v276_v46  ;;  %v296_v54 = vadd.f32 %v295_v49, %v294_v45 }
 0x1eb   : > { %v305_v56 = vrot.slane %v304_v52, 2  ;;  %446 = vpush %v278_v53  ;;  %v297_v57 = vrot.slane %v296_v54, 1 }
 0x1ec   : > { %448 = vpush %v288_v55 }
 0x1ed   : > { %v306_v58 = vadd.f32 %v305_v56, %v304_v52  ;;  %v298_v59 = vadd.f32 %v297_v57, %v296_v54 }
 0x1ef   : > { %450 = vpush %v298_v59  ;;  %v307_v60 = vrot.slane %v306_v58, 1 }
 0x1f1   : > { %v308_v61 = vadd.f32 %v307_v60, %v306_v58 }
 0x1f3   : > { %452 = vpush %v308_v61 }
 0x21c   : > { %s447_s14 = spop %446 }
 0x21d   : > { %v315_v1 = vstv %s447_s14  ;;  %s449_s20 = spop %448 }
 0x21e   : > { %v320_v3 = vstv %s449_s20  ;;  %v316_v5 = vmul.f32 %v439_v0, %v315_v1 }
 0x21f   : > { %v321_v6 = vmul.f32 %v440_v2, %v320_v3 }
 0x220   : > { %s451_s23 = spop %450 }
 0x221   : > { %v326_v7 = vstv %s451_s23  ;;  %v322_v11 = vadd.f32 %v321_v6, %v316_v5 }
 0x222   : > { %v327_v8 = vmul.f32 %v441_v4, %v326_v7 }
 0x224   : > { %s453_s27 = spop %452  ;;  %v328_v13 = vadd.f32 %v327_v8, %v322_v11 }
 0x225   : > { %v332_v12 = vstv %s453_s27 }
 0x226   : > { %v333_v14 = vmul.f32 %v442_v10, %v332_v12 }
 0x228   : > { %v334_v15 = vadd.f32 %v333_v14, %v328_v13 }
 0x22a   : > { %336 = vst.msk [vmem:[%s213_s29] sm:$0x1] %vm335_vm8, %v334_v15 }
 0x22b   : > { %515 = shalt.err (!%p512_p3)
}
 0x22c   : > { %s516_s12 = scalar_lea.hbm %s348_s7, 16  ;;  %s520_s20 = scalar_lea.hbm %s710_s4, 32 }
 0x22d   : > { %p517_p4 = scmp.ne.s32.totalorder %s348_s7, %s516_s12  ;;  %p521_p9 = scmp.lt.s32.totalorder %s348_s7, %s710_s4 }
 0x22e   : > { %p522_p10 = scmp.lt.s32.totalorder %s520_s20, %s516_s12 }
 0x22f   : > { %p518_p7 = pnand %p517_p4, %p630_p5 }
 0x230   : > { %p523_p11 = por %p522_p10, %p521_p9 }
 0x231   : > { %p519_p8 = pneg %p518_p7 }
 0x233   : > { %p524_p12 = pnand %p523_p11, %p519_p8 }
 0x235   : > { %527 = shalt.err (!%p524_p12)
}
 0x236   : > { %454 = dma.vmem_to_hbm [thread:$0]  (%p630_p5), %s351_s30, 16, %s348_s7, %s338_s8  }
 0x237 PF: > { %p460_p13 = scmp.ge.s32.totalorder %s562_s18, 2  ;;  %s362_s27 = sand.u32 1, %s550_s15  }
 0x238   : > { %s363_s28 = scalar_lea.sflag [#allocation3], %s362_s27 }
 0x239   : > { %p457_p0 = pnand %p460_p13, %p634_p6 }
 0x23b   : > { %p458_p1 = pneg %p457_p0 }
 0x23d   : > { %545 = dma.done.wait (%p458_p1), %s363_s28, 16  }
 0x23e   : > { %547 = vsyncadd (%p458_p1), %s363_s28, 4294967280  ;;  %p14_p2 = scmp.ge.s32.totalorder %s617_s21, 4   ;;  %s713_s15 = smov %s554_s16 }
 0x23f   : > { %s714_s16 = smov %s558_s17  ;;  %s715_s17 = smov %s628_s24 }
 0x240   : > { %s716_s18 = smov %s617_s21  ;;  %16 = sbr.rel (!%p14_p2) target bundleno = 3 (0x3), region = 77 }
 0x245   :  { %367 = vsyncpa [#allocation3], 1 }
 0x246   :  { %369 = vsyncpa [#allocation3 + $0x1], 1 }

</bundles_post_ra>
